<compile_context>
chip_gen: v7x
topology: tpu7x:2x2x1
jax: 0.10.0
libtpu: 0.0.40
codegen_flags: <defaults>
</compile_context>

<pallas_src>
import functools

import jax
import jax.numpy as jnp
from jax.experimental import pallas as pl
from jax.experimental.pallas import tpu as pltpu


_NUM_PARTIALS = 2  # leading "parallel" grid axis -> both TensorCores on v7x.


def _round_up(x, m):
    return ((x + m - 1) // m) * m


def _select_batch_tile(B, C_padded, itemsize):
    """Largest batch tile whose double-buffered inputs fit a safe VMEM budget."""
    sub = 8 if itemsize >= 4 else 16           # sublane packing (f32 vs bf16)
    input_budget = 32 * 1024 * 1024            # 2 inputs x 2 pipeline buffers
    cap = input_budget // (4 * C_padded * itemsize)
    cap = max(sub, (cap // sub) * sub)
    cap = min(cap, 1024)                       # diminishing returns past ~1024 rows
    bt = min(cap, _round_up(B, sub))
    bt = max(sub, (bt // sub) * sub)
    return bt


def _distill_kl_kernel(ys_ref, yt_ref, out_ref, acc_ref, *, inv_T, scale):
    i = pl.program_id(1)

    @pl.when(i == 0)
    def _():
        acc_ref[...] = jnp.zeros_like(acc_ref)

    zs = ys_ref[...].astype(jnp.float32) * inv_T
    zt = yt_ref[...].astype(jnp.float32) * inv_T

    zs_max = jnp.max(zs, axis=-1, keepdims=True)          # (bt, 1)
    zt_max = jnp.max(zt, axis=-1, keepdims=True)          # (bt, 1)
    es = jnp.exp(zs - zs_max)                              # (bt, C)
    et = jnp.exp(zt - zt_max)                              # (bt, C)
    ds = jnp.sum(es, axis=-1, keepdims=True)               # (bt, 1)
    dt = jnp.sum(et, axis=-1, keepdims=True)               # (bt, 1)
    s = jnp.sum(et * (zt - zs), axis=-1, keepdims=True)    # (bt, 1)

    # Per-row KL using sum_c p_t == 1:
    #   sum_c p_t (log p_t - log p_s)
    #     = (1/dt) * sum_c e^{zt - zt_max} (zt - zs)
    #       + (zs_max - zt_max + log ds - log dt)
    kl_row = s * pl.reciprocal(dt, approx=False) + (
        zs_max - zt_max + jnp.log(ds) - jnp.log(dt))

    acc_ref[...] += kl_row                                 # pure VPU add, no reduce

    @pl.when(i == pl.num_programs(1) - 1)
    def _():
        total = jnp.sum(acc_ref[...]) * scale              # one-time epilogue reduce
        out_ref[...] = jnp.zeros_like(out_ref) + total     # lane-dense full-block store


def distill_kl(y_s, y_t, T):
    """KD loss matching PyTorch DistillKL.forward (kl_div reduction='sum')."""
    assert y_s.shape == y_t.shape and y_s.ndim == 2
    B, C = y_s.shape
    itemsize = jnp.dtype(y_s.dtype).itemsize

    C_pad = _round_up(C, 128)
    bt = _select_batch_tile(B, C_pad, itemsize)
    B_pad = _round_up(B, _NUM_PARTIALS * bt)
    n_inner = B_pad // (_NUM_PARTIALS * bt)

    if C_pad != C:
        # Pad classes with a large negative logit on BOTH inputs: exp underflows
        # to exactly 0 and (zt - zs) == 0 there, so padded classes contribute 0.
        pad_c = ((0, 0), (0, C_pad - C))
        y_s = jnp.pad(y_s, pad_c, constant_values=-1e9)
        y_t = jnp.pad(y_t, pad_c, constant_values=-1e9)
    if B_pad != B:
        # Zero rows have y_s == y_t -> their KL contribution is exactly 0.
        pad_b = ((0, B_pad - B), (0, 0))
        y_s = jnp.pad(y_s, pad_b)
        y_t = jnp.pad(y_t, pad_b)

    kernel = functools.partial(
        _distill_kl_kernel,
        inv_T=1.0 / float(T),
        scale=float(T) * float(T) / float(B),
    )

    # 2 inputs x 2 pipeline buffers + accumulator + output blocks, plus headroom.
    vmem_needed = 4 * bt * C_pad * itemsize + bt * 4 + 2 * 8 * 128 * 4
    vmem_limit = int(vmem_needed + 8 * 1024 * 1024)
    # TODO(synk): for vocab-scale C a full-C block may exceed v7x's 64 MiB VMEM;
    # add a class-chunk grid axis with an online (flash-style) max/denominator.

    out = pl.pallas_call(
        kernel,
        out_shape=jax.ShapeDtypeStruct((_NUM_PARTIALS, 8, 128), jnp.float32),
        grid_spec=pltpu.PrefetchScalarGridSpec(
            num_scalar_prefetch=0,
            grid=(_NUM_PARTIALS, n_inner),
            in_specs=[
                pl.BlockSpec((bt, C_pad), lambda p, i: (p * n_inner + i, 0)),
                pl.BlockSpec((bt, C_pad), lambda p, i: (p * n_inner + i, 0)),
            ],
            out_specs=pl.BlockSpec((1, 8, 128), lambda p, i: (p, 0, 0)),
            scratch_shapes=[pltpu.VMEM((bt, 1), jnp.float32)],
        ),
        compiler_params=pltpu.CompilerParams(
            dimension_semantics=("parallel", "arbitrary"),
            vmem_limit_bytes=vmem_limit,
        ),
    )(y_s, y_t)

    # Each partial block is filled with that sweep's partial loss; take one lane
    # per partial and add them.
    return jnp.sum(out[:, 0, 0])


def _reference(y_s, y_t, T):
    zs = y_s.astype(jnp.float32) / T
    zt = y_t.astype(jnp.float32) / T
    log_ps = jax.nn.log_softmax(zs, axis=1)
    p_t = jax.nn.softmax(zt, axis=1)
    log_pt = jax.nn.log_softmax(zt, axis=1)
    return jnp.sum(p_t * (log_pt - log_ps)) * (T * T) / y_s.shape[0]


if __name__ == "__main__":
    key = jax.random.PRNGKey(0)
    k1, k2 = jax.random.split(key)
    B, C = 16, 128  # small, tile-friendly classification logits
    T = 4.0

    y_s = jax.random.normal(k1, (B, C), dtype=jnp.float32)
    y_t = jax.random.normal(k2, (B, C), dtype=jnp.float32)

    loss = distill_kl(y_s, y_t, T)
    loss = jax.block_until_ready(loss)

    ref = _reference(y_s, y_t, T)
    assert jnp.allclose(loss, ref, rtol=1e-4, atol=1e-5), (loss, ref)

    print("KERNEL_OK")
</pallas_src>

<mosaic_0001>
module attributes {stable_mosaic.version = 11 : i64} {
  func.func @_distill_kl_kernel(%arg0: i32, %arg1: i32, %arg2: memref<16x128xf32, #tpu.memory_space<vmem>>, %arg3: memref<16x128xf32, #tpu.memory_space<vmem>>, %arg4: memref<1x8x128xf32, #tpu.memory_space<vmem>>, %arg5: memref<16x1xf32, #tpu.memory_space<vmem>>) attributes {dimension_semantics = [#tpu.dimension_semantics<parallel>, #tpu.dimension_semantics<arbitrary>], iteration_bounds = array<i64: 2, 1>, scalar_prefetch = 0 : i64, scratch_operands = 1 : i64, tpu.core_type = #tpu.core_type<tc>, window_params = [{transform_indices = @transform_0, window_bounds = array<i64: 16, 128>}, {transform_indices = @transform_1, window_bounds = array<i64: 16, 128>}, {transform_indices = @transform_2, window_bounds = array<i64: 1, 8, 128>}]} {
    %c0_i32 = arith.constant 0 : i32
    %0 = arith.cmpi eq, %arg1, %c0_i32 : i32
    %1 = arith.extui %0 : i1 to i32
    %c0_i32_0 = arith.constant 0 : i32
    %2 = arith.cmpi ne, %1, %c0_i32_0 : i32
    scf.if %2 {
      %cst_16 = arith.constant 0.000000e+00 : f32
      %41 = vector.broadcast %cst_16 : f32 to vector<16x1xf32>
      %c0_17 = arith.constant 0 : index
      %c0_18 = arith.constant 0 : index
      %42 = vector.load %arg5[%c0_17, %c0_18] : memref<16x1xf32, #tpu.memory_space<vmem>>, vector<16x1xf32>
      tpu.vector_store %arg5[%c0_17, %c0_18], %41 {strides = array<i32>} : memref<16x1xf32, #tpu.memory_space<vmem>>, vector<16x1xf32>,
    } else {
    }
    %c0 = arith.constant 0 : index
    %c0_1 = arith.constant 0 : index
    %3 = vector.load %arg2[%c0, %c0_1] : memref<16x128xf32, #tpu.memory_space<vmem>>, vector<16x128xf32>
    %cst = arith.constant 2.500000e-01 : f32
    %4 = vector.broadcast %cst : f32 to vector<16x128xf32>
    %5 = arith.mulf %3, %4 : vector<16x128xf32>
    %c0_2 = arith.constant 0 : index
    %c0_3 = arith.constant 0 : index
    %6 = vector.load %arg3[%c0_2, %c0_3] : memref<16x128xf32, #tpu.memory_space<vmem>>, vector<16x128xf32>
    %cst_4 = arith.constant 2.500000e-01 : f32
    %7 = vector.broadcast %cst_4 : f32 to vector<16x128xf32>
    %8 = arith.mulf %6, %7 : vector<16x128xf32>
    %cst_5 = arith.constant dense<0xFF800000> : vector<16xf32>
    %9 = vector.multi_reduction <maximumf>, %5, %cst_5 [1] : vector<16x128xf32> to vector<16xf32>
    %10 = vector.shape_cast %9 : vector<16xf32> to vector<16x1xf32>
    %cst_6 = arith.constant dense<0xFF800000> : vector<16xf32>
    %11 = vector.multi_reduction <maximumf>, %8, %cst_6 [1] : vector<16x128xf32> to vector<16xf32>
    %12 = vector.shape_cast %11 : vector<16xf32> to vector<16x1xf32>
    %13 = vector.broadcast %10 : vector<16x1xf32> to vector<16x128xf32>
    %14 = arith.subf %5, %13 : vector<16x128xf32>
    %15 = math.exp %14 : vector<16x128xf32>
    %16 = vector.broadcast %12 : vector<16x1xf32> to vector<16x128xf32>
    %17 = arith.subf %8, %16 : vector<16x128xf32>
    %18 = math.exp %17 : vector<16x128xf32>
    %cst_7 = arith.constant dense<0.000000e+00> : vector<16xf32>
    %19 = vector.multi_reduction <add>, %15, %cst_7 [1] : vector<16x128xf32> to vector<16xf32>
    %20 = vector.shape_cast %19 : vector<16xf32> to vector<16x1xf32>
    %cst_8 = arith.constant dense<0.000000e+00> : vector<16xf32>
    %21 = vector.multi_reduction <add>, %18, %cst_8 [1] : vector<16x128xf32> to vector<16xf32>
    %22 = vector.shape_cast %21 : vector<16xf32> to vector<16x1xf32>
    %23 = arith.subf %8, %5 : vector<16x128xf32>
    %24 = arith.mulf %18, %23 : vector<16x128xf32>
    %cst_9 = arith.constant dense<0.000000e+00> : vector<16xf32>
    %25 = vector.multi_reduction <add>, %24, %cst_9 [1] : vector<16x128xf32> to vector<16xf32>
    %26 = vector.shape_cast %25 : vector<16xf32> to vector<16x1xf32>
    %27 = tpu.reciprocal %22 : vector<16x1xf32> -> vector<16x1xf32>
    %28 = arith.mulf %26, %27 : vector<16x1xf32>
    %29 = arith.subf %10, %12 : vector<16x1xf32>
    %30 = math.log %20 : vector<16x1xf32>
    %31 = arith.addf %29, %30 : vector<16x1xf32>
    %32 = math.log %22 : vector<16x1xf32>
    %33 = arith.subf %31, %32 : vector<16x1xf32>
    %34 = arith.addf %28, %33 : vector<16x1xf32>
    %c0_10 = arith.constant 0 : index
    %c0_11 = arith.constant 0 : index
    %35 = vector.load %arg5[%c0_10, %c0_11] : memref<16x1xf32, #tpu.memory_space<vmem>>, vector<16x1xf32>
    %36 = arith.addf %35, %34 : vector<16x1xf32>
    %c0_12 = arith.constant 0 : index
    %c0_13 = arith.constant 0 : index
    %37 = vector.load %arg5[%c0_12, %c0_13] : memref<16x1xf32, #tpu.memory_space<vmem>>, vector<16x1xf32>
    tpu.vector_store %arg5[%c0_12, %c0_13], %36 {strides = array<i32>} : memref<16x1xf32, #tpu.memory_space<vmem>>, vector<16x1xf32>,
    %c0_i32_14 = arith.constant 0 : i32
    %38 = arith.cmpi eq, %arg1, %c0_i32_14 : i32
    %39 = arith.extui %38 : i1 to i32
    %c0_i32_15 = arith.constant 0 : i32
    %40 = arith.cmpi ne, %39, %c0_i32_15 : i32
    scf.if %40 {
      %c0_16 = arith.constant 0 : index
      %c0_17 = arith.constant 0 : index
      %41 = vector.load %arg5[%c0_16, %c0_17] : memref<16x1xf32, #tpu.memory_space<vmem>>, vector<16x1xf32>
      %42 = vector.shape_cast %41 : vector<16x1xf32> to vector<1x16x1xf32>
      %cst_18 = arith.constant dense<0.000000e+00> : vector<1xf32>
      %43 = vector.multi_reduction <add>, %42, %cst_18 [1, 2] : vector<1x16x1xf32> to vector<1xf32>
      %44 = vector.shape_cast %43 : vector<1xf32> to vector<1x1x1xf32>
      %45 = vector.extract %44[0, 0, 0] : f32 from vector<1x1x1xf32>
      %cst_19 = arith.constant 1.000000e+00 : f32
      %46 = arith.mulf %45, %cst_19 : f32
      %cst_20 = arith.constant 0.000000e+00 : f32
      %47 = vector.broadcast %cst_20 : f32 to vector<1x8x128xf32>
      %48 = vector.broadcast %46 : f32 to vector<1x8x128xf32>
      %49 = arith.addf %47, %48 : vector<1x8x128xf32>
      %c0_21 = arith.constant 0 : index
      %c0_22 = arith.constant 0 : index
      %c0_23 = arith.constant 0 : index
      %50 = vector.load %arg4[%c0_21, %c0_22, %c0_23] : memref<1x8x128xf32, #tpu.memory_space<vmem>>, vector<1x8x128xf32>
      tpu.vector_store %arg4[%c0_21, %c0_22, %c0_23], %49 {strides = array<i32>} : memref<1x8x128xf32, #tpu.memory_space<vmem>>, vector<1x8x128xf32>,
    } else {
    }
    return
  }
  func.func @transform_0(%arg0: i32, %arg1: i32) -> (i32, i32) {
    %c1_i32 = arith.constant 1 : i32
    %0 = arith.muli %arg0, %c1_i32 : i32
    %1 = arith.addi %0, %arg1 : i32
    %c0_i32 = arith.constant 0 : i32
    %c0_i32_0 = arith.constant 0 : i32
    return %1, %c0_i32 : i32, i32
  }
  func.func @transform_1(%arg0: i32, %arg1: i32) -> (i32, i32) {
    %c1_i32 = arith.constant 1 : i32
    %0 = arith.muli %arg0, %c1_i32 : i32
    %1 = arith.addi %0, %arg1 : i32
    %c0_i32 = arith.constant 0 : i32
    %c0_i32_0 = arith.constant 0 : i32
    return %1, %c0_i32 : i32, i32
  }
  func.func @transform_2(%arg0: i32, %arg1: i32) -> (i32, i32, i32) {
    %c0_i32 = arith.constant 0 : i32
    %c0_i32_0 = arith.constant 0 : i32
    %c0_i32_1 = arith.constant 0 : i32
    return %arg0, %c0_i32, %c0_i32_0 : i32, i32, i32
  }
}

</mosaic_0001>

<bundles_post_ra>
// kernel: tpu_custom_call.1
= control target key start
LH: loop header
LB: loop body
LE: loop exit
PB: predicated region body
PF: predicated region fallthrough
CT: control target
= control target key end

     0   :  { %7 = vsyncpa [#allocation4], 0  ;;  %s961_s0 = inlined_call_operand.hbm [shape: f32[32,128], index: 0, kind: input, shape index: {}]   ;;  %s962_s1 = inlined_call_operand.hbm [shape: f32[32,128], index: 1, kind: input, shape index: {}]   ;;  %s963_s2 = inlined_call_operand.hbm [shape: f32[2,8,128], index: 2, kind: output, shape index: {}]  }
   0x1   :  { %9 = vsyncpa [#allocation4 + $0x1], 0 }
   0x2   :  { %10 = vsyncpa [#allocation7], 0 }
   0x3   :  { %12 = vsyncpa [#allocation7 + $0x1], 0 }
   0x4   :  { %13 = vsyncpa [#allocation5], 0 }
   0x5   :  { %15 = vsyncpa [#allocation5 + $0x1], 0  ;;  %s720_s9 = smov 0   ;;  %s722_s10 = smov 0  }
   0x6   :  { %s724_s11 = smov 0   ;;  %s726_s12 = smov 0  }
   0x7   :  { %s728_s13 = smov 0   ;;  %s730_s14 = smov 0  }
   0x8 LB: > { %s439_s15 = sadd.s32 4294967295, %s697_s14   ;;  %s440_s16 = sadd.s32 4294967294, %s697_s14   ;;  %s697_s14 = sphi %s730_s14, %s21_s14   ;;  %s693_s13 = sphi %s728_s13, %s981_s13   ;;  %s689_s12 = sphi %s726_s12, %s980_s12   ;;  %s685_s11 = sphi %s724_s11, %s979_s11   ;;  %s681_s10 = sphi %s722_s10, %s978_s10   ;;  %s677_s9 = sphi %s720_s9, %s977_s9  }
   0x9   : > { %s33_s17 = sadd.s32 1, %s693_s13  ;;  %s42_s18 = sadd.s32 1, %s685_s11 }
   0xa   : > { %p35_p0 = scmp.ge.s32.totalorder %s33_s17, 2  ;;  %p49_p1 = scmp.ne.s32.totalorder %s685_s11, %s681_s10 }
   0xb   : > { %p50_p2 = scmp.eq.s32.totalorder %s697_s14, 0  ;;  %p55_p3 = scmp.ne.s32.totalorder %s681_s10, %s677_s9 }
   0xc   : > { %s983_s17 = smov (%p35_p0, %s33_s17), 0  ;;  %p56_p5 = scmp.eq.s32.totalorder %s439_s15, 0 }
   0xd   : > { %p761_p4 = por %p50_p2, %p49_p1  ;;  %s39_s20 = ssub.s32 %s693_s13, %s983_s17 }
   0xe   : > { %p107_p6 = scmp.eq.s32.totalorder %s439_s15, 1  ;;  %p40_p7 = scmp.eq.s32.totalorder %s39_s20, 0 }
   0xf   : > { %p767_p8 = por %p56_p5, %p55_p3  ;;  %p113_p10 = scmp.eq.s32.totalorder %s440_s16, 1 }
  0x10   : > { %p771_p9 = por %p107_p6, %p49_p1  ;;  %p478_p13 = scmp.lt.s32.totalorder %s697_s14, 2 }
  0x11   : > { %s967_s21 = scalar_select %p767_p8, 1, 0 }
  0x12   : > { %s968_s22 = scalar_select %p771_p9, 1, 0 }
  0x13   : > { %s776_s23 = scalar_select %p40_p7, %s685_s11, %s42_s18  }
  0x14   : > { %p778_p11 = por %p113_p10, %p55_p3  ;;  %s785_s25 = sand.u32 1, %s685_s11  }
  0x15   : > { %s443_s26 = sshll.u32 %s785_s25, 4  ;;  %s457_s27 = sshll.u32 %s693_s13, 8 }
  0x16   : > { %s969_s24 = scalar_select %p778_p11, 1, 0 }
  0x17   : > { %s794_s30 = scalar_lea.hbm %s961_s0, %s457_s27  ;;  %s137_s3 = scalar_lea.vmem [#allocation3], %s443_s26 }
  0x18   : > { %s145_s4 = sshll.u32 %s137_s3, 4  ;;  %p802_p0 = pnand %p478_p13, %p761_p4  ;;  %s798_s4 = int_to_ptr.vmem [resolvable:$true] %s145_s4 }
  0x19   : > { %s134_s6 = scalar_lea.sflag [#allocation4], %s785_s25  ;;  %s551_s7 = scalar_lea.hbm %s794_s30, 256 }
  0x1a   : > { %p552_p2 = scmp.ne.s32.totalorder %s794_s30, %s551_s7  ;;  %p553_p3 = pneg %p802_p0 }
  0x1b   : > { %s556_s16 = scalar_lea.hbm %s961_s0, 512  ;;  %p557_p4 = scmp.lt.u32.totalorder %s794_s30, %s961_s0 }
  0x1c   : > { %p554_p5 = pnand %p553_p3, %p552_p2  ;;  %p558_p7 = scmp.lt.u32.totalorder %s556_s16, %s551_s7 }
  0x1d   : > { %p560_p13 = scmp.lt.u32.totalorder %s551_s7, %s794_s30 }
  0x1e   : > { %p555_p6 = pneg %p554_p5  ;;  %p559_p10 = por %p558_p7, %p557_p4 }
  0x20   : > { %p561_p12 = por %p560_p13, %p559_p10 }
  0x22   : > { %p562_p1 = pnand %p561_p12, %p555_p6 }
  0x24   : > { %565 = shalt.err (!%p562_p1)
}
  0x25   : > { %s566_s20 = scalar_lea.vmem %s798_s4, 256  ;;  %s699_s28 = smov [#allocation3]  }
  0x26   : > { %p567_p2 = scmp.ne.s32.totalorder %s798_s4, %s566_s20  ;;  %s571_s29 = sshll.u32 %s699_s28, 4  ;;  %s572_s29 = int_to_ptr.vmem [resolvable:$false] %s571_s29 }
  0x27   : > { %s573_s3 = scalar_lea.vmem %s572_s29, 512  ;;  %p574_p9 = scmp.lt.s32.totalorder %s798_s4, %s572_s29 }
  0x28   : > { %p569_p5 = pnand %p567_p2, %p553_p3  ;;  %p575_p4 = scmp.lt.s32.totalorder %s573_s3, %s566_s20 }
  0x2a   : > { %p570_p11 = pneg %p569_p5  ;;  %p576_p7 = por %p575_p4, %p574_p9 }
  0x2c   : > { %p577_p10 = pnand %p576_p7, %p570_p11 }
  0x2e   : > { %580 = shalt.err (!%p577_p10)
}
  0x2f   : > { %s700_s7 = smov 128   ;;  %s701_s8 = smov 8  }
  0x30   : > { %470 = dma.hbm_to_vmem [thread:$0]  (!%p802_p0), %s794_s30, 256, %s798_s4, %s134_s6, %s700_s7, %s700_s7, %s701_s8  }
  0x31   : > { %p175_p9 = scmp.lt.s32.totalorder %s697_s14, 3  ;;  %s844_s18 = scalar_lea.hbm %s962_s1, %s457_s27 }
  0x32   : > { %p971_p11 = scmp.ge.s32.totalorder %s697_s14, 1  ;;  %s159_s20 = scalar_lea.vmem [#allocation6], %s443_s26 }
  0x33   : > { %s167_s28 = sshll.u32 %s159_s20, 4  ;;  %s156_s30 = scalar_lea.sflag [#allocation7], %s785_s25  ;;  %s854_s28 = int_to_ptr.vmem [resolvable:$true] %s167_s28 }
  0x34   : > { %p848_p12 = pnand %p971_p11, %p175_p9  ;;  %s581_s4 = scalar_lea.hbm %s844_s18, 256 }
  0x35   : > { %p582_p1 = scmp.ne.s32.totalorder %s844_s18, %s581_s4  ;;  %s586_s29 = scalar_lea.hbm %s962_s1, 512 }
  0x36   : > { %p587_p2 = scmp.lt.u32.totalorder %s844_s18, %s962_s1  ;;  %p588_p5 = scmp.lt.u32.totalorder %s586_s29, %s581_s4 }
  0x37   : > { %p584_p6 = pnand %p582_p1, %p553_p3  ;;  %p590_p7 = scmp.lt.u32.totalorder %s581_s4, %s844_s18 }
  0x38   : > { %p589_p4 = por %p588_p5, %p587_p2 }
  0x39   : > { %p585_p13 = pneg %p584_p6 }
  0x3a   : > { %p591_p10 = por %p590_p7, %p589_p4 }
  0x3c   : > { %p592_p9 = pnand %p591_p10, %p585_p13 }
  0x3e   : > { %595 = shalt.err (!%p592_p9)
}
  0x3f   : > { %s596_s26 = scalar_lea.vmem %s854_s28, 256  ;;  %s702_s16 = smov [#allocation6]  }
  0x40   : > { %p597_p11 = scmp.ne.s32.totalorder %s854_s28, %s596_s26  ;;  %s601_s20 = sshll.u32 %s702_s16, 4  ;;  %s602_s20 = int_to_ptr.vmem [resolvable:$false] %s601_s20 }
  0x41   : > { %s603_s27 = scalar_lea.vmem %s602_s20, 512  ;;  %p604_p8 = scmp.lt.s32.totalorder %s854_s28, %s602_s20 }
  0x42   : > { %p599_p1 = pnand %p597_p11, %p553_p3  ;;  %p605_p2 = scmp.lt.s32.totalorder %s603_s27, %s596_s26 }
  0x44   : > { %p600_p6 = pneg %p599_p1  ;;  %p606_p5 = por %p605_p2, %p604_p8 }
  0x46   : > { %p607_p4 = pnand %p606_p5, %p600_p6 }
  0x48   : > { %610 = shalt.err (!%p607_p4)
}
  0x49   : > { %473 = dma.hbm_to_vmem [thread:$0]  (!%p802_p0), %s844_s18, 256, %s854_s28, %s156_s30, %s700_s7, %s700_s7, %s701_s8  }
  0x4a   : > { %179 = sbr.rel (%p848_p12) target bundleno = 645 (0x285), region = 28  ;;  %s888_s4 = sand.u32 (!%p848_p12), 1, %s681_s10  }
  0x4b   : > { %s450_s6 = sshll.u32 (!%p848_p12), %s888_s4, 4  ;;  %s182_s29 = scalar_lea.sflag (!%p848_p12), [#allocation4], %s888_s4 }
  0x4c   : > { %s185_s5 = scalar_lea.vmem (!%p848_p12), [#allocation3], %s450_s6  ;;  %p973_p8 = scmp.ne.s32.totalorder (!%p848_p12), %s967_s21, 0 }
  0x51   : > { %664 = dma.done.wait (%p973_p8), %s182_s29, 256  }
  0x52   : > { %666 = vsyncadd (%p973_p8), %s182_s29, 4294967040  ;;  %s191_s25 = scalar_lea.sflag [#allocation7], %s888_s4  ;;  %s194_s7 = scalar_lea.vmem [#allocation6], %s450_s6 }
  0x53   : > { %668 = dma.done.wait (%p973_p8), %s191_s25, 256  }
  0x54   : > { %670 = vsyncadd (%p973_p8), %s191_s25, 4294967040  ;;  %v235_v0 = vld [vmem:[%s194_s7] sm:$0xff]  ;;  %v236_v2 = vld [vmem:[%s194_s7 + $0x8] sm:$0xff]  ;;  %vm228_vm0 = vcmask 7168   ;;  %v703_v29 = vmov 0.0   ;;  %s452_s21 = sshll.u32 %s888_s4, 3 }
  0x55   : > { %v231_v1 = vld [vmem:[%s185_s5] sm:$0xff]  ;;  %v237_v3 = vmul.f32 0.25, %v235_v0  ;;  %v232_v5 = vld [vmem:[%s185_s5 + $0x8] sm:$0xff]  ;;  %v238_v6 = vmul.f32 0.25, %v236_v2  ;;  %229 = vst.msk [vmem:[#allocation2] sm:$0xff] %vm228_vm0, %v703_v29  ;;  %230 = vst.msk [vmem:[#allocation2 + $0x8] sm:$0xff] %vm228_vm0, %v703_v29 }
  0x56   : > { %v233_v4 = vmul.f32 0.25, %v231_v1  ;;  %v234_v7 = vmul.f32 0.25, %v232_v5  ;;  %s219_s8 = scalar_lea.vmem [#allocation8], %s452_s21  ;;  %s454_s19 = sshll.u32 %s689_s12, 7 }
  0x57   : > { %243 = vmax.xlane.f32.xlu1 %v237_v3  ;;  %s336_s18 = sshll.u32 %s219_s8, 4  ;;  %s914_s15 = scalar_lea.hbm %s963_s2, %s454_s19  ;;  %s909_s18 = int_to_ptr.vmem [resolvable:$true] %s336_s18 }
  0x58   : > { %239 = vmax.xlane.f32.xlu0 %v233_v4  ;;  %v267_v23 = vsub.f32 %v237_v3, %v233_v4  ;;  %v268_v27 = vsub.f32 %v238_v6, %v234_v7  ;;  %s323_s26 = scalar_lea.sflag [#allocation5], %s888_s4  ;;  %s611_s16 = scalar_lea.vmem %s909_s18, 128 }
  0x59   : > { %p612_p0 = scmp.ne.s32.totalorder %s909_s18, %s611_s16  ;;  %p974_p3 = scmp.ne.s32.totalorder %s968_s22, 0 }
  0x5a   : > { %s704_s12 = smov [#allocation8]  }
  0x5b   : > { %245 = vmax.xlane.f32.xlu1 %v238_v6  ;;  %p613_p12 = pnand %p612_p0, %p974_p3  ;;  %s615_s20 = sshll.u32 %s704_s12, 4  ;;  %s616_s20 = int_to_ptr.vmem [resolvable:$false] %s615_s20 }
  0x5c   : > { %241 = vmax.xlane.f32.xlu0 %v234_v7  ;;  %v295_v50 = vld [vmem:[#allocation2] sm:$0xff]  ;;  %v296_v56 = vld [vmem:[#allocation2 + $0x8] sm:$0xff]  ;;  %s617_s27 = scalar_lea.vmem %s616_s20, 256  ;;  %p618_p7 = scmp.lt.s32.totalorder %s909_s18, %s616_s20 }
  0x5d   : > { %p614_p13 = pneg %p613_p12  ;;  %p619_p10 = scmp.lt.s32.totalorder %s617_s27, %s611_s16 }
  0x5f   : > { %p620_p9 = por %p619_p10, %p618_p7 }
  0x61   : > { %p621_p11 = pnand %p620_p9, %p614_p13 }
  0xe4   : > { %v244_v8 = vpop.xlane.xlu1 %243 }
  0xe5   : > { %v240_v9 = vpop.xlane.xlu0 %239  ;;  %v253_v10 = vsub.f32 %v237_v3, %v244_v8 }
  0xe6   : > { %v247_v11 = vsub.f32 %v233_v4, %v240_v9  ;;  %v279_v12 = vsub.f32 %v240_v9, %v244_v8 }
  0xe7   : > { %v255_v14 = vmul.f32 1.442695, %v253_v10 }
  0xe8   : > { %v249_v13 = vmul.f32 1.442695, %v247_v11  ;;  %v246_v15 = vpop.xlane.xlu1 %245 }
  0xe9   : > { %v242_v16 = vpop.xlane.xlu0 %241  ;;  %v254_v17 = vsub.f32 %v238_v6, %v246_v15 }
  0xea   : > { %v248_v18 = vsub.f32 %v234_v7, %v242_v16  ;;  %531 = vpow2.f32 %v249_v13  ;;  %v280_v43 = vsub.f32 %v242_v16, %v246_v15 }
  0xeb   : > { %533 = vpow2.f32 %v255_v14  ;;  %v257_v20 = vmul.f32 1.442695, %v254_v17 }
  0xec   : > { %v251_v19 = vmul.f32 1.442695, %v248_v18 }
  0xee   : > { %535 = vpow2.f32 %v251_v19 }
  0xef   : > { %537 = vpow2.f32 %v257_v20 }
  0xf4   : > { %v532_v21 = vpop.eup %531 }
  0xf5   : > { %259 = vadd.xlane.f32.xlu0 %v532_v21  ;;  %v534_v22 = vpop.eup %533 }
  0xf6   : > { %v269_v26 = vmul.f32 %v534_v22, %v267_v23 }
  0xf8   : > { %v536_v24 = vpop.eup %535 }
  0xf9   : > { %263 = vadd.xlane.f32.xlu0 %v534_v22  ;;  %261 = vadd.xlane.f32.xlu1 %v536_v24  ;;  %v538_v25 = vpop.eup %537 }
  0xfa   : > { %v270_v28 = vmul.f32 %v538_v25, %v268_v27 }
  0xfd   : > { %265 = vadd.xlane.f32.xlu1 %v538_v25  ;;  %271 = vadd.xlane.f32.xlu0 %v269_v26 }
 0x101   : > { %273 = vadd.xlane.f32.xlu1 %v270_v28 }
 0x182   : > { %v260_v30 = vpop.xlane.xlu0 %259 }
 0x183   : > { %539 = vlog2.f32 %v260_v30 }
 0x186   : > { %v262_v31 = vpop.xlane.xlu1 %261  ;;  %v264_v32 = vpop.xlane.xlu0 %263 }
 0x187   : > { %541 = vlog2.f32 %v262_v31 }
 0x188   : > { %543 = vrcp.f32 %v264_v32 }
 0x189   : > { %545 = vlog2.f32 %v264_v32 }
 0x18a   : > { %v266_v33 = vpop.xlane.xlu1 %265  ;;  %v272_v44 = vpop.xlane.xlu0 %271 }
 0x18b   : > { %547 = vrcp.f32 %v266_v33 }
 0x18c   : > { %549 = vlog2.f32 %v266_v33 }
 0x18d   : > { %v540_v34 = vpop.eup %539 }
 0x18e   : > { %v282_v35 = vmul.f32 0.6931472, %v540_v34  ;;  %v274_v52 = vpop.xlane.xlu1 %273 }
 0x190   : > { %v285_v40 = vadd.f32 %v282_v35, %v279_v12 }
 0x191   : > { %v542_v36 = vpop.eup %541 }
 0x192   : > { %v544_v37 = vpop.eup %543  ;;  %v284_v39 = vmul.f32 0.6931472, %v542_v36 }
 0x193   : > { %v546_v38 = vpop.eup %545  ;;  %v277_v47 = vmul.f32 %v544_v37, %v272_v44 }
 0x194   : > { %v288_v41 = vmul.f32 0.6931472, %v546_v38  ;;  %v286_v48 = vadd.f32 %v284_v39, %v280_v43 }
 0x195   : > { %v548_v42 = vpop.eup %547 }
 0x196   : > { %v550_v45 = vpop.eup %549  ;;  %v291_v46 = vsub.f32 %v285_v40, %v288_v41  ;;  %v278_v54 = vmul.f32 %v548_v42, %v274_v52 }
 0x197   : > { %v290_v49 = vmul.f32 0.6931472, %v550_v45 }
 0x198   : > { %v293_v51 = vadd.f32 %v291_v46, %v277_v47 }
 0x199   : > { %v292_v53 = vsub.f32 %v286_v48, %v290_v49 }
 0x19a   : > { %v297_v55 = vadd.f32 %v295_v50, %v293_v51 }
 0x19b   : > { %v294_v57 = vadd.f32 %v292_v53, %v278_v54 }
 0x19c   : > { %300 = vst.msk [vmem:[#allocation2] sm:$0xff] %vm228_vm0, %v297_v55 }
 0x19d   : > { %v298_v58 = vadd.f32 %v296_v56, %v294_v57 }
 0x19f   : > { %301 = vst.msk [vmem:[#allocation2 + $0x8] sm:$0xff] %vm228_vm0, %v298_v58 }
 0x1a3   : > { %v305_v59 = vld [vmem:[#allocation2] sm:$0xff] }
 0x1a4   : > { %v307_v61 = vsel %vm228_vm0, %v305_v59, 0.0 }
 0x1a6   : > { %v306_v60 = vld [vmem:[#allocation2 + $0x8] sm:$0xff] }
 0x1a7   : > { %v308_v62 = vsel %vm228_vm0, %v306_v60, 0.0 }
 0x1a8   : > { %v309_v63 = vadd.f32 %v308_v62, %v307_v61 }
 0x1aa   : > { %310 = vadd.xlane.f32.xlu0 %v309_v63 }
 0x237   : > { %v311_v0 = vpop.xlane.xlu0 %310 }
 0x238   : > { %v312_v1 = vrot.slane %v311_v0, 4 }
 0x23a   : > { %v313_v2 = vadd.f32 %v312_v1, %v311_v0 }
 0x23c   : > { %v314_v3 = vrot.slane %v313_v2, 2 }
 0x23e   : > { %v315_v4 = vadd.f32 %v314_v3, %v313_v2 }
 0x240   : > { %v316_v5 = vrot.slane %v315_v4, 1 }
 0x242   : > { %v317_v6 = vadd.f32 %v316_v5, %v315_v4 }
 0x244   : > { %459 = vpush %v317_v6 }
 0x275   : > { %s460_s28 = spop %459 }
 0x276   : > { %v319_v7 = vstv %s460_s28 }
 0x277   : > { %321 = vst [vmem:[%s219_s8] sm:$0xff] %v319_v7 }
 0x278   : > { %624 = shalt.err (!%p621_p11)
}
 0x279   : > { %s625_s4 = scalar_lea.hbm %s914_s15, 128  ;;  %s629_s5 = scalar_lea.hbm %s963_s2, 256 }
 0x27a   : > { %p626_p1 = scmp.ne.s32.totalorder %s914_s15, %s625_s4  ;;  %p630_p5 = scmp.lt.u32.totalorder %s914_s15, %s963_s2 }
 0x27b   : > { %p631_p4 = scmp.lt.u32.totalorder %s629_s5, %s625_s4  ;;  %p633_p0 = scmp.lt.u32.totalorder %s625_s4, %s914_s15 }
 0x27c   : > { %p627_p6 = pnand %p626_p1, %p974_p3 }
 0x27d   : > { %p632_p8 = por %p631_p4, %p630_p5 }
 0x27e   : > { %p628_p2 = pneg %p627_p6 }
 0x27f   : > { %p634_p12 = por %p633_p0, %p632_p8 }
 0x281   : > { %p635_p13 = pnand %p634_p12, %p628_p2 }
 0x283   : > { %638 = shalt.err (!%p635_p13)
}
 0x284   : > { %465 = dma.vmem_to_hbm [thread:$0]  (%p974_p3), %s909_s18, 128, %s914_s15, %s323_s26  }
 0x285 PF: > { %s348_s21 = sand.u32 1, %s677_s9   ;;  %p975_p7 = scmp.ne.s32.totalorder %s969_s24, 0 }
 0x286   : > { %p976_p10 = scmp.ge.s32.totalorder %s697_s14, 2  ;;  %s349_s8 = scalar_lea.sflag [#allocation5], %s348_s21 }
 0x288   : > { %p475_p9 = pnand %p976_p10, %p975_p7 }
 0x28a   : > { %672 = dma.done.wait (!%p475_p9), %s349_s8, 128  }
 0x28b   : > { %674 = vsyncadd (!%p475_p9), %s349_s8, 4294967168  ;;  %s21_s14 = sadd.s32 1, %s697_s14   ;;  %s977_s9 = smov %s681_s10 }
 0x28c   : > { %p18_p11 = scmp.ge.s32.totalorder %s21_s14, 4   ;;  %s978_s10 = smov %s685_s11 }
 0x28d   : > { %s979_s11 = smov %s776_s23  ;;  %s980_s12 = smov %s693_s13 }
 0x28e   : > { %s981_s13 = smov %s983_s17  ;;  %20 = sbr.rel (!%p18_p11) target bundleno = 8 (0x8), region = 94 }
 0x295   :  { %354 = vsyncpa [#allocation4], 1 }
 0x296   :  { %356 = vsyncpa [#allocation4 + $0x1], 1 }
 0x297   :  { %357 = vsyncpa [#allocation7], 1 }
 0x298   :  { %359 = vsyncpa [#allocation7 + $0x1], 1 }
 0x299   :  { %360 = vsyncpa [#allocation5], 1 }
 0x29a   :  { %362 = vsyncpa [#allocation5 + $0x1], 1 }

</bundles_post_ra>
